<compile_context>
chip_gen: v5e
topology: v5e:2x2
jax: 0.10.0
libtpu: 0.0.40
codegen_flags: <defaults>
</compile_context>

<pallas_src>
import math

import jax
import jax.numpy as jnp
from jax.experimental import pallas as pl
from jax.experimental.pallas import tpu as pltpu


def actor_kernel(x_ref, w1_ref, b1_ref, w2_ref, b2_ref, w3_ref, b3_ref, o_ref):
    # fc1 + ReLU  (bf16 MXU operands, f32 accumulation and elementwise math)
    h1 = jnp.dot(x_ref[...], w1_ref[...], preferred_element_type=jnp.float32)
    h1 = jnp.maximum(h1 + b1_ref[...], 0.0)
    # fc2 + ReLU
    h2 = jnp.dot(h1.astype(jnp.bfloat16), w2_ref[...],
                 preferred_element_type=jnp.float32)
    h2 = jnp.maximum(h2 + b2_ref[...], 0.0)
    # fc3 + Tanh (tanh goes to the EUP, f32)
    h3 = jnp.dot(h2.astype(jnp.bfloat16), w3_ref[...],
                 preferred_element_type=jnp.float32)
    o_ref[...] = jnp.tanh(h3 + b3_ref[...])


def _round_up(x, m):
    return (x + m - 1) // m * m


def _cdiv(a, b):
    return (a + b - 1) // b


def _choose_tiling(batch, cap=1024, min_steps=2):
    """Batch tile size tm and padded batch b_pad.

    - At least `min_steps` logical steps when batch is large enough, so the
      "parallel" grid axis can shard across v7x's two TensorCores.
    - At most `cap` rows per step (amortizes per-step overhead on v5e/v6e
      while staying tiny in VMEM).
    - Rows split evenly across steps so b_pad - batch < 8 + tm rounding,
      instead of up to tm-1 wasted rows.
    """
    steps = max(min_steps, _cdiv(batch, cap))
    tm = max(8, _round_up(_cdiv(batch, steps), 8))
    b_pad = _round_up(batch, tm)
    return tm, b_pad


def prepare_actor_params(params):
    """One-time static preparation of the weights for the kernel.

    Weights (already stored transposed as [in, out]) are cast to bf16 for the
    MXU; biases stay f32.  Call once and reuse the result across forward calls.
    """
    return {
        "w1": params["w1"].astype(jnp.bfloat16),
        "w2": params["w2"].astype(jnp.bfloat16),
        "w3": params["w3"].astype(jnp.bfloat16),
        "b1": params["b1"].astype(jnp.float32),
        "b2": params["b2"].astype(jnp.float32),
        "b3": params["b3"].astype(jnp.float32),
    }


def actor_forward(x, prepared):
    """x: [batch, state_size] float32. prepared: output of prepare_actor_params."""
    w1, b1 = prepared["w1"], prepared["b1"]
    w2, b2 = prepared["w2"], prepared["b2"]
    w3, b3 = prepared["w3"], prepared["b3"]

    batch, state_size = x.shape
    f1 = w1.shape[1]
    f2 = w2.shape[1]
    action_size = w3.shape[1]

    tm, b_pad = _choose_tiling(batch)

    # Cast x to bf16 first, then pad only the batch (sublane) axis.
    x_bf = x.astype(jnp.bfloat16)
    if b_pad != batch:
        x_bf = jnp.zeros((b_pad, state_size), jnp.bfloat16).at[:batch].set(x_bf)

    grid = (b_pad // tm,)

    flops = 2 * b_pad * (state_size * f1 + f1 * f2 + f2 * action_size)
    bytes_accessed = (
        b_pad * state_size * 2                      # bf16 x
        + (w1.size + w2.size + w3.size) * 2         # bf16 weights
        + (b1.size + b2.size + b3.size) * 4         # f32 biases
        + b_pad * action_size * 4                   # f32 output
    )
    cost = pl.CostEstimate(flops=flops,
                           transcendentals=b_pad * action_size,
                           bytes_accessed=bytes_accessed)

    out_padded = pl.pallas_call(
        actor_kernel,
        out_shape=jax.ShapeDtypeStruct((b_pad, action_size), jnp.float32),
        grid=grid,
        in_specs=[
            # x tile marches over the batch axis; last dim is the full
            # (unpadded) state_size, which BlockSpec allows.
            pl.BlockSpec((tm, state_size), lambda i: (i, 0)),
            # Weights / biases: constant index_map -> VMEM-resident, loaded once.
            pl.BlockSpec((state_size, f1), lambda i: (0, 0)),
            pl.BlockSpec((1, f1), lambda i: (0, 0)),
            pl.BlockSpec((f1, f2), lambda i: (0, 0)),
            pl.BlockSpec((1, f2), lambda i: (0, 0)),
            pl.BlockSpec((f2, action_size), lambda i: (0, 0)),
            pl.BlockSpec((1, action_size), lambda i: (0, 0)),
        ],
        # Output at true width: (tm, action_size) blocks, no lane padding.
        out_specs=pl.BlockSpec((tm, action_size), lambda i: (i, 0)),
        compiler_params=pltpu.CompilerParams(
            dimension_semantics=("parallel",)),
        cost_estimate=cost,
    )(x_bf, w1, b1, w2, b2, w3, b3)

    return out_padded[:batch]


def init_actor_params(key, state_size, action_size, fc1_size=256, fc2_size=128):
    """Deterministic init mirroring the PyTorch module's reset_parameters().

    Note: PyTorch hidden_init() uses weight.size(0) (== out_features) as
    "fan_in"; we replicate that exact behavior for the weight limits.
    """
    k1, k2, k3, kb1, kb2, kb3 = jax.random.split(key, 6)

    lim1 = 1.0 / math.sqrt(fc1_size)   # weight.size(0) of fc1
    lim2 = 1.0 / math.sqrt(fc2_size)   # weight.size(0) of fc2
    lim3 = 0.003

    # PyTorch Linear weight is [out, in]; we store transposed [in, out].
    w1 = jax.random.uniform(k1, (state_size, fc1_size), jnp.float32, -lim1, lim1)
    w2 = jax.random.uniform(k2, (fc1_size, fc2_size), jnp.float32, -lim2, lim2)
    w3 = jax.random.uniform(k3, (fc2_size, action_size), jnp.float32, -lim3, lim3)

    # Biases keep PyTorch Linear default init: U(-1/sqrt(in_features), ...).
    bl1 = 1.0 / math.sqrt(state_size)
    bl2 = 1.0 / math.sqrt(fc1_size)
    bl3 = 1.0 / math.sqrt(fc2_size)
    b1 = jax.random.uniform(kb1, (1, fc1_size), jnp.float32, -bl1, bl1)
    b2 = jax.random.uniform(kb2, (1, fc2_size), jnp.float32, -bl2, bl2)
    b3 = jax.random.uniform(kb3, (1, action_size), jnp.float32, -bl3, bl3)

    return {"w1": w1, "b1": b1, "w2": w2, "b2": b2, "w3": w3, "b3": b3}


if __name__ == "__main__":
    key = jax.random.PRNGKey(0)
    k_params, k_x = jax.random.split(key)

    # Small, Reacher-like sizes: state_size=33, action_size=4, batch=2.
    batch, state_size, action_size = 2, 33, 4
    params = init_actor_params(k_params, state_size, action_size)
    prepared = prepare_actor_params(params)   # one-time static prep (bf16 cast)
    x = jax.random.normal(k_x, (batch, state_size), jnp.float32)

    out = actor_forward(x, prepared)
    out = jax.block_until_ready(out)

    # Sanity check against a pure-JAX f32 reference of the same forward pass.
    # Tolerance is loosened because the kernel uses bf16 MXU operands
    # (f32 accumulation).
    h1 = jnp.maximum(x @ params["w1"] + params["b1"], 0.0)
    h2 = jnp.maximum(h1 @ params["w2"] + params["b2"], 0.0)
    ref = jnp.tanh(h2 @ params["w3"] + params["b3"])
    assert out.shape == (batch, action_size)
    assert jnp.allclose(out, ref, atol=2e-2, rtol=2e-2), (
        f"max abs err {jnp.max(jnp.abs(out - ref))}")

    print("KERNEL_OK")
</pallas_src>

<mosaic_0001>
module attributes {stable_mosaic.version = 11 : i64} {
  func.func @actor_kernel(%arg0: i32, %arg1: memref<8x33xbf16, #tpu.memory_space<vmem>>, %arg2: memref<33x256xbf16, #tpu.memory_space<vmem>>, %arg3: memref<1x256xf32, #tpu.memory_space<vmem>>, %arg4: memref<256x128xbf16, #tpu.memory_space<vmem>>, %arg5: memref<1x128xf32, #tpu.memory_space<vmem>>, %arg6: memref<128x4xbf16, #tpu.memory_space<vmem>>, %arg7: memref<1x4xf32, #tpu.memory_space<vmem>>, %arg8: memref<8x4xf32, #tpu.memory_space<vmem>>) attributes {dimension_semantics = [#tpu.dimension_semantics<parallel>], iteration_bounds = array<i64: 1>, scalar_prefetch = 0 : i64, scratch_operands = 0 : i64, tpu.core_type = #tpu.core_type<tc>, window_params = [{transform_indices = @transform_0, window_bounds = array<i64: 8, 33>}, {pipeline_mode = #tpu.pipeline_mode<synchronous>, transform_indices = @transform_1, window_bounds = array<i64: 33, 256>}, {pipeline_mode = #tpu.pipeline_mode<synchronous>, transform_indices = @transform_2, window_bounds = array<i64: 1, 256>}, {pipeline_mode = #tpu.pipeline_mode<synchronous>, transform_indices = @transform_3, window_bounds = array<i64: 256, 128>}, {pipeline_mode = #tpu.pipeline_mode<synchronous>, transform_indices = @transform_4, window_bounds = array<i64: 1, 128>}, {pipeline_mode = #tpu.pipeline_mode<synchronous>, transform_indices = @transform_5, window_bounds = array<i64: 128, 4>}, {pipeline_mode = #tpu.pipeline_mode<synchronous>, transform_indices = @transform_6, window_bounds = array<i64: 1, 4>}, {transform_indices = @transform_7, window_bounds = array<i64: 8, 4>}]} {
    %c0 = arith.constant 0 : index
    %c0_0 = arith.constant 0 : index
    %0 = vector.load %arg1[%c0, %c0_0] : memref<8x33xbf16, #tpu.memory_space<vmem>>, vector<8x33xbf16>
    %c0_1 = arith.constant 0 : index
    %c0_2 = arith.constant 0 : index
    %1 = vector.load %arg2[%c0_1, %c0_2] : memref<33x256xbf16, #tpu.memory_space<vmem>>, vector<33x256xbf16>
    %cst = arith.constant dense<0.000000e+00> : vector<8x256xf32>
    %2 = tpu.matmul %0, %1, %cst {dimension_numbers = #tpu.dot_dimension_numbers<[1], [0], [0], [1], [0, 0, 1, 1], [], []>} : vector<8x33xbf16>, vector<33x256xbf16>, vector<8x256xf32> -> vector<8x256xf32>
    %c0_3 = arith.constant 0 : index
    %c0_4 = arith.constant 0 : index
    %3 = vector.load %arg3[%c0_3, %c0_4] : memref<1x256xf32, #tpu.memory_space<vmem>>, vector<1x256xf32>
    %4 = vector.broadcast %3 : vector<1x256xf32> to vector<8x256xf32>
    %5 = arith.addf %2, %4 : vector<8x256xf32>
    %cst_5 = arith.constant 0.000000e+00 : f32
    %6 = vector.broadcast %cst_5 : f32 to vector<8x256xf32>
    %7 = arith.maximumf %5, %6 : vector<8x256xf32>
    %8 = arith.truncf %7 : vector<8x256xf32> to vector<8x256xbf16>
    %c0_6 = arith.constant 0 : index
    %c0_7 = arith.constant 0 : index
    %9 = vector.load %arg4[%c0_6, %c0_7] : memref<256x128xbf16, #tpu.memory_space<vmem>>, vector<256x128xbf16>
    %cst_8 = arith.constant dense<0.000000e+00> : vector<8x128xf32>
    %10 = tpu.matmul %8, %9, %cst_8 {dimension_numbers = #tpu.dot_dimension_numbers<[1], [0], [0], [1], [0, 0, 1, 1], [], []>} : vector<8x256xbf16>, vector<256x128xbf16>, vector<8x128xf32> -> vector<8x128xf32>
    %c0_9 = arith.constant 0 : index
    %c0_10 = arith.constant 0 : index
    %11 = vector.load %arg5[%c0_9, %c0_10] : memref<1x128xf32, #tpu.memory_space<vmem>>, vector<1x128xf32>
    %12 = vector.broadcast %11 : vector<1x128xf32> to vector<8x128xf32>
    %13 = arith.addf %10, %12 : vector<8x128xf32>
    %cst_11 = arith.constant 0.000000e+00 : f32
    %14 = vector.broadcast %cst_11 : f32 to vector<8x128xf32>
    %15 = arith.maximumf %13, %14 : vector<8x128xf32>
    %16 = arith.truncf %15 : vector<8x128xf32> to vector<8x128xbf16>
    %c0_12 = arith.constant 0 : index
    %c0_13 = arith.constant 0 : index
    %17 = vector.load %arg6[%c0_12, %c0_13] : memref<128x4xbf16, #tpu.memory_space<vmem>>, vector<128x4xbf16>
    %cst_14 = arith.constant dense<0.000000e+00> : vector<8x4xf32>
    %18 = tpu.matmul %16, %17, %cst_14 {dimension_numbers = #tpu.dot_dimension_numbers<[1], [0], [0], [1], [0, 0, 1, 1], [], []>} : vector<8x128xbf16>, vector<128x4xbf16>, vector<8x4xf32> -> vector<8x4xf32>
    %c0_15 = arith.constant 0 : index
    %c0_16 = arith.constant 0 : index
    %19 = vector.load %arg7[%c0_15, %c0_16] : memref<1x4xf32, #tpu.memory_space<vmem>>, vector<1x4xf32>
    %20 = vector.broadcast %19 : vector<1x4xf32> to vector<8x4xf32>
    %21 = arith.addf %18, %20 : vector<8x4xf32>
    %22 = math.tanh %21 : vector<8x4xf32>
    %c0_17 = arith.constant 0 : index
    %c0_18 = arith.constant 0 : index
    %23 = vector.load %arg8[%c0_17, %c0_18] : memref<8x4xf32, #tpu.memory_space<vmem>>, vector<8x4xf32>
    tpu.vector_store %arg8[%c0_17, %c0_18], %22 {strides = array<i32>} : memref<8x4xf32, #tpu.memory_space<vmem>>, vector<8x4xf32>,
    return
  }
  func.func @transform_0(%arg0: i32) -> (i32, i32) {
    %c0_i32 = arith.constant 0 : i32
    %c0_i32_0 = arith.constant 0 : i32
    return %arg0, %c0_i32 : i32, i32
  }
  func.func @transform_1(%arg0: i32) -> (i32, i32) {
    %c0_i32 = arith.constant 0 : i32
    %c0_i32_0 = arith.constant 0 : i32
    %c0_i32_1 = arith.constant 0 : i32
    return %c0_i32, %c0_i32_0 : i32, i32
  }
  func.func @transform_2(%arg0: i32) -> (i32, i32) {
    %c0_i32 = arith.constant 0 : i32
    %c0_i32_0 = arith.constant 0 : i32
    %c0_i32_1 = arith.constant 0 : i32
    return %c0_i32, %c0_i32_0 : i32, i32
  }
  func.func @transform_3(%arg0: i32) -> (i32, i32) {
    %c0_i32 = arith.constant 0 : i32
    %c0_i32_0 = arith.constant 0 : i32
    %c0_i32_1 = arith.constant 0 : i32
    return %c0_i32, %c0_i32_0 : i32, i32
  }
  func.func @transform_4(%arg0: i32) -> (i32, i32) {
    %c0_i32 = arith.constant 0 : i32
    %c0_i32_0 = arith.constant 0 : i32
    %c0_i32_1 = arith.constant 0 : i32
    return %c0_i32, %c0_i32_0 : i32, i32
  }
  func.func @transform_5(%arg0: i32) -> (i32, i32) {
    %c0_i32 = arith.constant 0 : i32
    %c0_i32_0 = arith.constant 0 : i32
    %c0_i32_1 = arith.constant 0 : i32
    return %c0_i32, %c0_i32_0 : i32, i32
  }
  func.func @transform_6(%arg0: i32) -> (i32, i32) {
    %c0_i32 = arith.constant 0 : i32
    %c0_i32_0 = arith.constant 0 : i32
    %c0_i32_1 = arith.constant 0 : i32
    return %c0_i32, %c0_i32_0 : i32, i32
  }
  func.func @transform_7(%arg0: i32) -> (i32, i32) {
    %c0_i32 = arith.constant 0 : i32
    %c0_i32_0 = arith.constant 0 : i32
    return %arg0, %c0_i32 : i32, i32
  }
}

</mosaic_0001>

<bundles_post_ra>
// kernel: tpu_custom_call.1
= control target key start
LH: loop header
LB: loop body
LE: loop exit
PB: predicated region body
PF: predicated region fallthrough
CT: control target
= control target key end

     0   :  { %12 = vsyncpa [#allocation3], 0  ;;  %s548_s27 = smov [#allocation2]   ;;  %s549_s29 = smov 64   ;;  %s661_s0 = inlined_call_operand.vmem [shape: bf16[8,33], index: 0, kind: input, shape index: {}]   ;;  %s662_s1 = inlined_call_operand.vmem [shape: bf16[33,256], index: 1, kind: input, shape index: {}]   ;;  %s663_s2 = inlined_call_operand.vmem [shape: f32[1,256], index: 2, kind: input, shape index: {}]   ;;  %s664_s3 = inlined_call_operand.hbm [shape: bf16[256,128], index: 3, kind: input, shape index: {}]   ;;  %s665_s4 = inlined_call_operand.vmem [shape: f32[1,128], index: 4, kind: input, shape index: {}]   ;;  %s666_s5 = inlined_call_operand.vmem [shape: bf16[128,4], index: 5, kind: input, shape index: {}]   ;;  %s667_s6 = inlined_call_operand.vmem [shape: f32[1,4], index: 6, kind: input, shape index: {}]   ;;  %s668_s7 = inlined_call_operand.vmem [shape: f32[8,4], index: 7, kind: output, shape index: {}]  }
   0x1   :  { %s23_s26 = sshll.u32 %s664_s3, 4  ;;  %s25_s28 = sshll.u32 %s548_s27, 4  ;;  %s24_s26 = int_to_ptr.hbm [resolvable:$true] %s23_s26  ;;  %s26_s28 = int_to_ptr.vmem [resolvable:$true] %s25_s28 }
   0x2   :  { %s550_s30 = smov 4  }
   0x3   :  { %31 = dma.hbm_to_vmem [thread:$0]  %s24_s26, 2048, %s26_s28, [#allocation3], %s549_s29, %s549_s29, %s550_s30  }
   0x4   :  { %546 = dma.done.wait [#allocation3], 2048  }
   0x5   :  { %547 = vsyncadd [#allocation3], 4294965248  ;;  %vm84_vm0 = vcmask 1040384   ;;  %v48_v0 = vld [vmem:[%s662_s1 + $0x20] sm:$0x11]  ;;  %v551_v2 = vmov 0  }
   0x6   :  { %v68_v1 = vunpack.c.l.b16 %v48_v0  ;;  %v86_v3 = vsel %vm84_vm0, 65535, %v551_v2  ;;  %v497_v5 = vld [vmem:[#allocation2 + $0x38] sm:$0xff]  ;;  %v382_v6 = vld [vmem:[%s662_s1 + $0x10] sm:$0xf]  ;;  %v69_v8 = vunpack.c.h.b16 %v48_v0  ;;  %v374_v14 = vld [vmem:[%s662_s1] sm:$0xf] }
   0x7   :  { %v489_v7 = vld [vmem:[%s662_s1 + $0x14] sm:$0xf0]  ;;  %255 = vmatpush.bf16.msra.mxu2 %v497_v5  ;;  %v496_v10 = vld [vmem:[#allocation2 + $0x30] sm:$0xff]  ;;  %v487_v15 = vld [vmem:[%s662_s1 + $0x4] sm:$0xf0]  ;;  %vm80_vm1 = vcmask 269312  }
   0x8   :  { %v74_v4 = vpack.c.b16 %v68_v1, %v68_v1  ;;  %v505_v11 = vld [vmem:[#allocation2 + $0x78] sm:$0xff]  ;;  %v383_v12 = vor.u32 %v489_v7, %v382_v6  ;;  %v504_v13 = vld [vmem:[#allocation2 + $0x70] sm:$0xff]  ;;  %v75_v16 = vpack.c.b16 %v69_v8, %v69_v8  ;;  %v495_v17 = vld [vmem:[#allocation2 + $0x28] sm:$0xff]  ;;  %v375_v18 = vor.u32 %v487_v15, %v374_v14 }
   0x9   :  { %268 = vmatpush.bf16.msra.mxu3 %v505_v11  ;;  %v488_v20 = vld [vmem:[%s662_s1 + $0x14] sm:$0xf]  ;;  %v384_v21 = vld [vmem:[%s662_s1 + $0x18] sm:$0xf0]  ;;  %v494_v22 = vld [vmem:[#allocation2 + $0x20] sm:$0xff]  ;;  %vm365_vm2 = vcmask 31744  }
   0xa   :  { %v88_v9 = vand.u32 %v86_v3, %v74_v4  ;;  %v91_v19 = vand.u32 %v86_v3, %v75_v16  ;;  %v43_v23 = vld [vmem:[%s661_s0] sm:$0xf]  ;;  %v387_v24 = vor.u32 %v488_v20, %v384_v21  ;;  %v486_v25 = vld [vmem:[%s662_s1 + $0x4] sm:$0xf]  ;;  %v376_v26 = vld [vmem:[%s662_s1 + $0x8] sm:$0xf0] }
   0xb   :  { %256 = vmatpush.bf16.msra.mxu2 %v496_v10  ;;  %v493_v27 = vld [vmem:[#allocation2 + $0x18] sm:$0xff]  ;;  %v379_v28 = vor.u32 %v486_v25, %v376_v26  ;;  %v492_v29 = vld [vmem:[#allocation2 + $0x10] sm:$0xff]  ;;  %v491_v30 = vld [vmem:[#allocation2 + $0x8] sm:$0xff] }
   0xc   :  { %98 = vmatpush.bf16.msra.mxu1 %v88_v9  ;;  %v503_v31 = vld [vmem:[#allocation2 + $0x68] sm:$0xff]  ;;  %v490_v32 = vld [vmem:[#allocation2] sm:$0xff]  ;;  %v501_v34 = vld [vmem:[#allocation2 + $0x58] sm:$0xff] }
   0xd   :  { %269 = vmatpush.bf16.msra.mxu3 %v504_v13  ;;  %v502_v33 = vld [vmem:[#allocation2 + $0x60] sm:$0xff]  ;;  %v500_v35 = vld [vmem:[#allocation2 + $0x50] sm:$0xff]  ;;  %v499_v36 = vld [vmem:[#allocation2 + $0x48] sm:$0xff] }
   0xe   :  { %v498_v37 = vld [vmem:[#allocation2 + $0x40] sm:$0xff]  ;;  %v513_v38 = vld [vmem:[%s666_s5 + $0x38] sm:$0xff]  ;;  %v512_v40 = vld [vmem:[%s666_s5 + $0x30] sm:$0xff] }
   0xf   :  { %257 = vmatpush.bf16.msra.mxu2 %v495_v17  ;;  %v49_v39 = vld [vmem:[%s663_s2] sm:$0x3]  ;;  %351 = vmatpush.bf16.msra.mxu0 %v513_v38  ;;  %v511_v53 = vld [vmem:[%s666_s5 + $0x28] sm:$0xff]  ;;  %v509_v55 = vld [vmem:[%s666_s5 + $0x18] sm:$0xff] }
  0x10   :  { %99 = vmatpush.bf16.msra.mxu1 %v383_v12  ;;  %v51_v41 = vperm.slane %v49_v39, 0  ;;  %v52_v47 = vperm.slane %v49_v39, 1  ;;  %v510_v54 = vld [vmem:[%s666_s5 + $0x20] sm:$0xff]  ;;  %v508_v56 = vld [vmem:[%s666_s5 + $0x10] sm:$0xff]  ;;  %v507_v57 = vld [vmem:[%s666_s5 + $0x8] sm:$0xff] }
  0x11   :  { %270 = vmatpush.bf16.msra.mxu3 %v503_v31  ;;  %v506_v58 = vld [vmem:[%s666_s5] sm:$0xff] }
  0x12   :  { %v518_v61 = vld [vmem:[%s665_s4] ss:$0 sm:$0xff] }
  0x13   :  { %258 = vmatpush.bf16.msra.mxu2 %v494_v22  ;;  %352 = vmatpush.bf16.msra.mxu0 %v512_v40  ;;  %v519_v4 = vld [vmem:[%s667_s6] ss:$0 sm:$0xff] }
  0x14   :  { %100 = vmatpush.bf16.msra.mxu1 %v375_v18 }
  0x15   :  { %271 = vmatpush.bf16.msra.mxu3 %v502_v33 }
  0x17   :  { %388 = vmatmul.msk.bf16.vlgmr.msra.gmra.mxu1 %vm80_vm1, %v43_v23  ;;  %259 = vmatpush.bf16.msra.mxu2 %v493_v27 }
  0x18   :  { %111 = vmatpush.bf16.msrb.mxu1 %v91_v19  ;;  %353 = vmatpush.bf16.msra.mxu0 %v511_v53 }
  0x19   :  { %272 = vmatpush.bf16.msra.mxu3 %v501_v34 }
  0x1b   :  { %260 = vmatpush.bf16.msra.mxu2 %v492_v29 }
  0x1c   :  { %112 = vmatpush.bf16.msrb.mxu1 %v387_v24  ;;  %354 = vmatpush.bf16.msra.mxu0 %v510_v54 }
  0x1d   :  { %273 = vmatpush.bf16.msra.mxu3 %v500_v35 }
  0x1f   :  { %261 = vmatpush.bf16.msra.mxu2 %v491_v30 }
  0x20   :  { %113 = vmatpush.bf16.msrb.mxu1 %v379_v28  ;;  %355 = vmatpush.bf16.msra.mxu0 %v509_v55 }
  0x21   :  { %274 = vmatpush.bf16.msra.mxu3 %v499_v36 }
  0x23   :  { %262 = vmatpush.bf16.msra.mxu2 %v490_v32 }
  0x24   :  { %356 = vmatpush.bf16.msra.mxu0 %v508_v56 }
  0x25   :  { %275 = vmatpush.bf16.msra.mxu3 %v498_v37 }
  0x27   :  { %389 = vmatmul.msk.bf16.vlgmr.msrb.gmra.mxu1 %vm80_vm1, %v43_v23 }
  0x28   :  { %357 = vmatpush.bf16.msra.mxu0 %v507_v57 }
  0x2c   :  { %358 = vmatpush.bf16.msra.mxu0 %v506_v58 }
  0x94   :  { %v102_v42 = vpop.f32.mrf.mxu1 }
  0x95   :  { %v103_v43 = vadd.f32 %v102_v42, %v51_v41 }
  0x97   :  { %v119_v44 = vmax.f32 %v103_v43, 0.0 }
  0x99   :  { %v121_v45 = vpack.c.bf16 %v119_v44, %v119_v44 }
  0x9b   :  { %263 = vmatmul.bf16.vlgmr.msra.gmra.mxu2 %v121_v45 }
  0x9c   :  { %v104_v46 = vpop.f32.mrf.mxu1 }
  0xa4   :  { %v115_v48 = vpop.f32.mrf.mxu1 }
  0xa5   :  { %v116_v49 = vadd.f32 %v115_v48, %v52_v47 }
  0xa7   :  { %v120_v50 = vmax.f32 %v116_v49, 0.0 }
  0xa9   :  { %v122_v51 = vpack.c.bf16 %v120_v50, %v120_v50 }
  0xab   :  { %276 = vmatmul.bf16.vlgmr.msra.gmra.mxu3 %v122_v51 }
  0xac   :  { %v117_v52 = vpop.f32.mrf.mxu1 }
 0x11e   :  { %v264_v59 = vpop.f32.mrf.mxu2 }
 0x11f   :  { %v265_v62 = vadd.f32 %v518_v61, %v264_v59 }
 0x126   :  { %v266_v60 = vpop.f32.mrf.mxu2 }
 0x12e   :  { %v277_v63 = vpop.f32.mrf.mxu3 }
 0x12f   :  { %v278_v0 = vadd.f32 %v277_v63, %v265_v62 }
 0x131   :  { %v281_v1 = vmax.f32 %v278_v0, 0.0 }
 0x133   :  { %v282_v2 = vpack.c.bf16 %v281_v1, %v281_v1 }
 0x135   :  { %359 = vmatmul.bf16.vlgmr.msra.gmra.mxu0 %v282_v2 }
 0x136   :  { %v279_v3 = vpop.f32.mrf.mxu3 }
 0x1b2   :  { %v360_v5 = vpop.f32.mrf.mxu0 }
 0x1b3   :  { %v361_v6 = vadd.f32 %v519_v4, %v360_v5 }
 0x1b5   :  { %520 = vtanh.f32 %v361_v6 }
 0x1ba   :  { %v362_v7 = vpop.f32.mrf.mxu0 }
 0x1bb   :  { %v521_v8 = vpop.eup %520 }
 0x1bc   :  { %366 = vst.msk [vmem:[%s668_s7] sm:$0xff] %vm365_vm2, %v521_v8 }
 0x1bd   :  { %371 = vsyncpa [#allocation3], 1 }

</bundles_post_ra>
